<compile_context>
chip_gen: v7x
topology: tpu7x:2x2x1
jax: 0.10.0
libtpu: 0.0.40
codegen_flags: <defaults>
</compile_context>

<pallas_src>
import functools

import jax
import jax.numpy as jnp
from jax.experimental import pallas as pl
from jax.experimental.pallas import tpu as pltpu


_LANE = 128
_MIB = 1024 * 1024


def _sublane_for(dtype):
    """Native sublane multiple for the dtype, or None if unsupported (sub-byte)."""
    dt = jnp.dtype(dtype)
    name = dt.name
    # Sub-byte dtypes (int4 / uint4 / fp4) are not tiled by this kernel.
    if name.endswith("4") or "e2m1" in name:
        return None
    return {4: 8, 2: 16, 1: 32}.get(dt.itemsize, None)


@functools.lru_cache(maxsize=1)
def _tpu_tuning():
    """Return (target_block_bytes, vmem_limit_bytes, cores_per_chip) for this device."""
    block_bytes = 4 * _MIB      # measured 85%+ roofline plateau on v5e/v6e
    vmem_limit = 32 * _MIB
    cores = 1
    vmem_cap = None
    try:
        info = pltpu.get_tpu_info()
        vmem_cap = getattr(info, "vmem_capacity_bytes", None)
    except Exception:
        vmem_cap = None
    try:
        kind = jax.devices()[0].device_kind.lower()
    except Exception:
        kind = ""
    if (vmem_cap is not None and vmem_cap <= 64 * _MIB) or ("v7" in kind):
        # v7x-like: 64 MiB/TC VMEM, ~3.2 TB/s HBM, 2 TCs/chip.  Bigger blocks
        # halve the per-step overhead tax; 4 double-buffered 8 MiB in/out
        # buffers (32 MiB) fit under a 44 MiB scoped limit.
        block_bytes = 8 * _MIB
        vmem_limit = 44 * _MIB
        cores = 2
    elif "v5" in kind:
        # v5e: 4 MiB steps already ~10 us at ~0.82 TB/s; keep the limit modest.
        vmem_limit = 24 * _MIB
    return block_bytes, vmem_limit, cores


def _clamp_kernel(x_ref, o_ref, *, min_val, max_val):
    x = x_ref[...]
    lo = jnp.asarray(min_val, dtype=x.dtype)
    hi = jnp.asarray(max_val, dtype=x.dtype)
    # torch.clamp(torch.clamp(x, min=lo), max=hi) == min(max(x, lo), hi); NaNs propagate.
    o_ref[...] = jnp.minimum(jnp.maximum(x, lo), hi)


def _pick_tile_rows(rows, lanes, itemsize, sublane, block_bytes, cores):
    """Tile rows: ~block_bytes per block, sublane-rounded, >= max(4, 2*cores) steps."""
    target_rows = max(sublane, block_bytes // (lanes * itemsize))
    # Keep enough grid steps that Pallas can overlap prefetch/compute/writeback
    # and the "parallel" axis can shard across megacore TCs.
    min_steps = max(4, 2 * cores)
    cap = (rows // min_steps // sublane) * sublane
    if cap >= sublane:
        target_rows = min(target_rows, cap)
    tile_rows = min(rows, target_rows)
    if rows >= sublane:
        tile_rows = max(sublane, (tile_rows // sublane) * sublane)
    else:
        tile_rows = rows  # block == full array dims: legal below one sublane tile
    return tile_rows


def _pick_layout(n, dtype, block_bytes, cores):
    """Return (rows, lanes, tile_rows) with rows*lanes == n, or None if ragged."""
    sublane = _sublane_for(dtype)
    if sublane is None:
        return None
    itemsize = jnp.dtype(dtype).itemsize
    lanes = None
    # Prefer the widest lane dim dividing n that still yields >= one sublane tile.
    for cand in (8192, 4096, 2048, 1024, 512, 256, 128):
        if n % cand == 0 and n // cand >= sublane:
            lanes = cand
            break
    if lanes is None:
        for cand in (8192, 4096, 2048, 1024, 512, 256, 128):
            if n % cand == 0:
                lanes = cand
                break
    if lanes is None:
        return None  # element count not a multiple of 128 -> ragged path
    rows = n // lanes
    tile_rows = _pick_tile_rows(rows, lanes, itemsize, sublane, block_bytes, cores)
    return rows, lanes, tile_rows


def _clamp_2d(x2d, min_val, max_val, tile_rows, vmem_limit, *, donate_input=False):
    rows, lanes = x2d.shape
    kernel = functools.partial(_clamp_kernel, min_val=min_val, max_val=max_val)
    return pl.pallas_call(
        kernel,
        out_shape=jax.ShapeDtypeStruct((rows, lanes), x2d.dtype),
        grid_spec=pltpu.PrefetchScalarGridSpec(
            num_scalar_prefetch=0,
            grid=(pl.cdiv(rows, tile_rows),),
            in_specs=[pl.BlockSpec((tile_rows, lanes), lambda i: (i, 0))],
            out_specs=pl.BlockSpec((tile_rows, lanes), lambda i: (i, 0)),
        ),
        compiler_params=pltpu.CompilerParams(
            dimension_semantics=("parallel",),
            vmem_limit_bytes=vmem_limit,
        ),
        input_output_aliases={0: 0} if donate_input else {},
    )(x2d)


def clamp_pallas(x, min_val=0.0, max_val=1.0, *, donate_input=False):
    """Elementwise clamp of `x` to [min_val, max_val] via a Pallas TPU kernel.

    Semantics match torch.clamp(torch.clamp(x, min), max): min first, then max,
    NaNs propagate.

    This op is purely HBM-bandwidth-bound; a standalone kernel can at best match
    a fused jnp.clip.  Prefer folding min/max into an adjacent producer/consumer
    kernel when one exists.  Set donate_input=True only when the caller donates
    `x` (enables XLA-level in-place update).
    """
    orig_shape = x.shape
    dtype = jnp.dtype(x.dtype)
    n = x.size
    if n == 0:
        return x

    # torch.clamp on integer tensors requires integral bounds; refuse to
    # silently truncate fractional bounds into the integer dtype.
    if dtype.kind in ("i", "u"):
        if float(min_val) != int(min_val) or float(max_val) != int(max_val):
            raise ValueError(
                "clamp_pallas: fractional bounds with an integer input dtype "
                "would silently truncate; cast the input to a float dtype first.")

    block_bytes, vmem_limit, cores = _tpu_tuning()
    sublane = _sublane_for(dtype)

    layout = _pick_layout(n, dtype, block_bytes, cores)
    if layout is not None:
        # Common case: pure reshape (an XLA-level view), no extra HBM traffic.
        rows, lanes, tile_rows = layout
        out2d = _clamp_2d(x.reshape(rows, lanes), min_val, max_val, tile_rows,
                          vmem_limit, donate_input=donate_input)
        return out2d.reshape(orig_shape)

    lo = jnp.asarray(min_val, dtype=dtype)
    hi = jnp.asarray(max_val, dtype=dtype)
    if sublane is None or n < sublane * _LANE:
        # Sub-byte dtype or tiny array: a plain fused elementwise op is optimal.
        return jnp.minimum(jnp.maximum(x, lo), hi)

    # Ragged fallback: run the kernel on the aligned prefix (no pad, no bulk
    # slice), clamp the short tail (< sublane*128 elements) with plain jnp,
    # and stitch the two pieces once.
    # TODO(synk): write the tail in-kernel with a masked store to drop the
    # concatenate's remaining extra HBM pass.
    itemsize = dtype.itemsize
    x_flat = x.reshape(-1)
    chunk = sublane * _LANE
    n_main = (n // chunk) * chunk
    rows_main = n_main // _LANE
    tile_rows = _pick_tile_rows(rows_main, _LANE, itemsize, sublane,
                                block_bytes, cores)
    out_main = _clamp_2d(x_flat[:n_main].reshape(rows_main, _LANE),
                         min_val, max_val, tile_rows, vmem_limit)
    out_tail = jnp.minimum(jnp.maximum(x_flat[n_main:], lo), hi)
    return jnp.concatenate([out_main.reshape(-1), out_tail]).reshape(orig_shape)


if __name__ == "__main__":
    key = jax.random.PRNGKey(0)
    min_val, max_val = 0.0, 1.0  # defaults from Clamp.__init__

    # Small NCHW-style input consistent with typical use of the module.
    x = jax.random.normal(key, (2, 4, 16, 16), dtype=jnp.float32) * 2.0
    out = jax.block_until_ready(clamp_pallas(x, min_val, max_val))
    ref = jnp.minimum(jnp.maximum(x, min_val), max_val)
    assert out.shape == x.shape and out.dtype == x.dtype
    assert jnp.allclose(out, ref), "mismatch vs reference clamp (main path)"

    # Ragged element count (exercises the aligned-prefix + tail path).
    x2 = jax.random.normal(jax.random.PRNGKey(1), (5, 13, 33), dtype=jnp.float32) * 3.0
    out2 = jax.block_until_ready(clamp_pallas(x2, min_val, max_val))
    ref2 = jnp.minimum(jnp.maximum(x2, min_val), max_val)
    assert out2.shape == x2.shape and out2.dtype == x2.dtype
    assert jnp.allclose(out2, ref2), "mismatch vs reference clamp (ragged path)"

    print("KERNEL_OK")
</pallas_src>

<mosaic_0001>
module attributes {stable_mosaic.version = 11 : i64} {
  func.func @_clamp_kernel(%arg0: i32, %arg1: memref<8x256xf32, #tpu.memory_space<vmem>>, %arg2: memref<8x256xf32, #tpu.memory_space<vmem>>) attributes {dimension_semantics = [#tpu.dimension_semantics<parallel>], iteration_bounds = array<i64: 1>, scalar_prefetch = 0 : i64, scratch_operands = 0 : i64, tpu.core_type = #tpu.core_type<tc>, window_params = [{transform_indices = @transform_0, window_bounds = array<i64: 8, 256>}, {transform_indices = @transform_1, window_bounds = array<i64: 8, 256>}]} {
    %c0 = arith.constant 0 : index
    %c0_0 = arith.constant 0 : index
    %0 = vector.load %arg1[%c0, %c0_0] : memref<8x256xf32, #tpu.memory_space<vmem>>, vector<8x256xf32>
    %cst = arith.constant 0.000000e+00 : f32
    %1 = vector.broadcast %cst : f32 to vector<8x256xf32>
    %2 = arith.maximumf %0, %1 : vector<8x256xf32>
    %cst_1 = arith.constant 1.000000e+00 : f32
    %3 = vector.broadcast %cst_1 : f32 to vector<8x256xf32>
    %4 = arith.minimumf %2, %3 : vector<8x256xf32>
    %c0_2 = arith.constant 0 : index
    %c0_3 = arith.constant 0 : index
    %5 = vector.load %arg2[%c0_2, %c0_3] : memref<8x256xf32, #tpu.memory_space<vmem>>, vector<8x256xf32>
    tpu.vector_store %arg2[%c0_2, %c0_3], %4 {strides = array<i32>} : memref<8x256xf32, #tpu.memory_space<vmem>>, vector<8x256xf32>,
    return
  }
  func.func @transform_0(%arg0: i32) -> (i32, i32) {
    %c0_i32 = arith.constant 0 : i32
    %c0_i32_0 = arith.constant 0 : i32
    return %arg0, %c0_i32 : i32, i32
  }
  func.func @transform_1(%arg0: i32) -> (i32, i32) {
    %c0_i32 = arith.constant 0 : i32
    %c0_i32_0 = arith.constant 0 : i32
    return %arg0, %c0_i32 : i32, i32
  }
}

</mosaic_0001>

<bundles_post_ra>
// kernel: tpu_custom_call.1
= control target key start
LH: loop header
LB: loop body
LE: loop exit
PB: predicated region body
PF: predicated region fallthrough
CT: control target
= control target key end

     0   :  { %6 = vsyncpa [#allocation3], 0  ;;  %s130_s0 = inlined_call_operand.hbm [shape: f32[8,256], index: 0, kind: input, shape index: {}]   ;;  %s131_s1 = inlined_call_operand.hbm [shape: f32[8,256], index: 1, kind: output, shape index: {}]  }
   0x1   :  { %7 = vsyncpa [#allocation4], 0  ;;  %s94_s6 = smov [#allocation2]   ;;  %s46_s10 = scalar_lea.hbm %s130_s0, 256 }
   0x2   :  { %s14_s7 = sshll.u32 %s94_s6, 4  ;;  %p47_p0 = scmp.ne.s32.totalorder %s130_s0, %s46_s10  ;;  %s15_s7 = int_to_ptr.vmem [resolvable:$true] %s14_s7 }
   0x3   :  { %p50_p1 = scmp.lt.u32.totalorder %s46_s10, %s130_s0 }
   0x5   :  { %p52_p2 = pnand %p50_p1, %p47_p0 }
   0x7   :  { %55 = shalt.err (!%p52_p2)
}
   0x8   :  { %s56_s15 = scalar_lea.vmem %s15_s7, 256  ;;  %p61_p4 = scmp.lt.s32.totalorder %s15_s7, %s15_s7 }
   0x9   :  { %p57_p3 = scmp.ne.s32.totalorder %s15_s7, %s56_s15  ;;  %p62_p5 = scmp.lt.s32.totalorder %s56_s15, %s56_s15 }
   0xb   :  { %p63_p6 = por %p62_p5, %p61_p4 }
   0xd   :  { %p64_p7 = pnand %p63_p6, %p57_p3 }
   0xf   :  { %67 = shalt.err (!%p64_p7)
}
  0x10   :  { %17 = dma.hbm_to_vmem [thread:$0]  %s130_s0, 256, %s15_s7, [#allocation3]  }
  0x11   :  { %90 = dma.done.wait [#allocation3], 256  }
  0x12   :  { %91 = vsyncadd [#allocation3], 4294967040  ;;  %v21_v0 = vld [vmem:[#allocation2] sm:$0xff]  ;;  %v22_v1 = vld [vmem:[#allocation2 + $0x8] sm:$0xff]  ;;  %s95_s18 = smov [#allocation5]  }
  0x13   :  { %s35_s19 = sshll.u32 %s95_s18, 4  ;;  %v23_v2 = vmax.f32 %v21_v0, 0.0  ;;  %v24_v3 = vmax.f32 %v22_v1, 0.0  ;;  %s36_s19 = int_to_ptr.vmem [resolvable:$true] %s35_s19 }
  0x14   :  { %s68_s20 = scalar_lea.vmem %s36_s19, 256  ;;  %p73_p9 = scmp.lt.s32.totalorder %s36_s19, %s36_s19 }
  0x15   :  { %v25_v4 = vmin.f32 %v23_v2, 1.0  ;;  %v26_v5 = vmin.f32 %v24_v3, 1.0  ;;  %p69_p8 = scmp.ne.s32.totalorder %s36_s19, %s68_s20  ;;  %p74_p10 = scmp.lt.s32.totalorder %s68_s20, %s68_s20 }
  0x17   :  { %27 = vst [vmem:[#allocation5] sm:$0xff] %v25_v4  ;;  %28 = vst [vmem:[#allocation5 + $0x8] sm:$0xff] %v26_v5  ;;  %p75_p11 = por %p74_p10, %p73_p9 }
  0x19   :  { %p76_p12 = pnand %p75_p11, %p69_p8 }
  0x1b   :  { %79 = shalt.err (!%p76_p12)
}
  0x1c   :  { %s80_s22 = scalar_lea.hbm %s131_s1, 256 }
  0x1d   :  { %p81_p13 = scmp.ne.s32.totalorder %s131_s1, %s80_s22  ;;  %p84_p0 = scmp.lt.u32.totalorder %s80_s22, %s131_s1 }
  0x1f   :  { %p86_p1 = pnand %p84_p0, %p81_p13 }
  0x21   :  { %89 = shalt.err (!%p86_p1)
}
  0x22   :  { %38 = dma.vmem_to_hbm [thread:$0]  %s36_s19, 256, %s131_s1, [#allocation4]  }
  0x23   :  { %92 = dma.done.wait [#allocation4], 256  }
  0x24   :  { %93 = vsyncadd [#allocation4], 4294967040 }
  0x25   :  { %42 = vsyncpa [#allocation3], 1 }
  0x26   :  { %43 = vsyncpa [#allocation4], 1 }

</bundles_post_ra>
